<compile_context>
chip_gen: v7x
topology: tpu7x:2x2x1
jax: 0.10.0
libtpu: 0.0.40
codegen_flags: <defaults>
</compile_context>

<pallas_src>
import jax
import jax.numpy as jnp
from jax.experimental import pallas as pl
from jax.experimental.pallas import tpu as pltpu


def _round_up(a, b):
    return (a + b - 1) // b * b


def _sublane_quantum(dtype):
    # Minimum second-to-last block dim: 8 for 32-bit, 16 for 16-bit, 32 for 8-bit.
    itemsize = jnp.dtype(dtype).itemsize
    return max(8, 32 // itemsize)


def _choose_tm(M, quantum, tm_target):
    """Pick the M-axis tile TM.

    Prefers divisors of M (no pad copy / no wasted MXU rows) that are sublane
    multiples, and prefers >=2 grid steps so v7x's two TensorCores both get work.
    Returns (TM, M_pad).
    """
    tm_cap = min(M, tm_target)
    divisors = [d for d in range(quantum, tm_cap + 1, quantum) if M % d == 0]
    if divisors:
        two_step = [d for d in divisors if M // d >= 2]
        return (max(two_step) if two_step else max(divisors)), M
    # No suitable divisor: fall back to padding M up to a TM multiple.
    tm = tm_target if M >= tm_target else _round_up(M, quantum)
    return tm, _round_up(M, tm)


def _patch_embed_kernel(p_ref, w_ref, b_ref, o_ref):
    # p_ref: (TM, K) patch rows       w_ref: (K, D_pad) flattened conv weight
    # b_ref: (1, D_pad) bias (f32)    o_ref: (TM, D_pad)
    acc = jnp.dot(p_ref[...], w_ref[...], preferred_element_type=jnp.float32)
    o_ref[...] = (acc + b_ref[...]).astype(o_ref.dtype)


def patch_embedding(x, weight, bias, patch_size, *,
                    compute_dtype=jnp.bfloat16, tm_target=512):
    """x: (B, C, H, W); weight: (D, C, p, p); bias: (D,). Returns (B, nP, D) in x.dtype."""
    B, C, H, W = x.shape
    D = weight.shape[0]
    p = patch_size
    assert H % p == 0 and W % p == 0, "Patch size not compatible with image size"
    nH, nW = H // p, W // p
    nP = nH * nW
    K = C * p * p
    M = B * nP  # batch collapsed into the matmul M dimension

    # Patchify (single XLA relayout): (B, C, H, W) -> (M, K); per-patch vector order
    # (C, p, p) matches the flattened PyTorch Conv2d weight (D, C, p, p).
    patches = x.reshape(B, C, nH, p, nW, p)
    patches = patches.transpose(0, 2, 4, 1, 3, 5).reshape(M, K)
    patches = patches.astype(compute_dtype)
    # TODO(synk): fold this relayout into the kernel (grid over batch with a full
    # (H, W) trailing block, XLU relayout in VMEM) to drop this remaining HBM pass.

    # K stays unpadded (block = full array dim).  Only D is padded to a lane multiple
    # so weight loads and (crucially) output stores are lane-dense.
    D_pad = _round_up(D, 128)
    quantum = _sublane_quantum(compute_dtype)
    TM, M_pad = _choose_tm(M, quantum, tm_target)
    if M_pad != M:
        patches = jnp.pad(patches, ((0, M_pad - M), (0, 0)))

    w_flat = weight.reshape(D, K).T.astype(compute_dtype)              # (K, D)
    w_p = jnp.pad(w_flat, ((0, 0), (0, D_pad - D)))
    b_p = jnp.pad(bias.astype(jnp.float32).reshape(1, D), ((0, 0), (0, D_pad - D)))

    in_bytes = jnp.dtype(compute_dtype).itemsize
    out_bytes = jnp.dtype(x.dtype).itemsize
    cost = pl.CostEstimate(
        flops=2 * M_pad * K * D_pad,
        transcendentals=0,
        bytes_accessed=(M_pad * K * in_bytes            # patches read
                        + K * D_pad * in_bytes          # weight read (once)
                        + D_pad * 4                     # bias read (once)
                        + M_pad * D_pad * out_bytes),   # output write
    )

    # Explicit VMEM budget: double-buffered (TM, K)/(TM, D_pad) tiles plus the
    # resident weight/bias, with generous margin.  Floor covers v5e's 16 MiB default
    # scoped limit; cap stays well under v7x's 64 MiB physical VMEM.
    vmem_needed = (2 * TM * (K * in_bytes + D_pad * out_bytes)
                   + 2 * (K * D_pad * in_bytes + D_pad * 4))
    vmem_limit = int(min(max(4 * vmem_needed, 16 << 20), 48 << 20))

    out_p = pl.pallas_call(
        _patch_embed_kernel,
        out_shape=jax.ShapeDtypeStruct((M_pad, D_pad), x.dtype),
        grid_spec=pltpu.PrefetchScalarGridSpec(
            num_scalar_prefetch=0,
            grid=(M_pad // TM,),
            in_specs=[
                pl.BlockSpec((TM, K), lambda m: (m, 0)),         # patches: tiled over M
                pl.BlockSpec((K, D_pad), lambda m: (0, 0)),      # weight: grid-invariant
                pl.BlockSpec((1, D_pad), lambda m: (0, 0)),      # bias:   grid-invariant
            ],
            out_specs=pl.BlockSpec((TM, D_pad), lambda m: (m, 0)),
        ),
        compiler_params=pltpu.CompilerParams(
            dimension_semantics=("parallel",),
            vmem_limit_bytes=vmem_limit),
        cost_estimate=cost,
    )(patches, w_p, b_p)

    # Strip padding; (B, nP, D) == conv(x).flatten(2, 3).permute(0, 2, 1).
    return out_p[:M, :D].reshape(B, nP, D)


if __name__ == "__main__":
    # Module defaults: in_channels=1, patch_size=7, embedding_dim=49, img_size=28.
    B, C, H, W = 2, 1, 28, 28
    patch_size = 7
    embedding_dim = 49

    key = jax.random.PRNGKey(0)
    kx, kw, kb = jax.random.split(key, 3)
    x = jax.random.normal(kx, (B, C, H, W), dtype=jnp.float32)
    fan_in = C * patch_size * patch_size
    weight = jax.random.normal(kw, (embedding_dim, C, patch_size, patch_size),
                               dtype=jnp.float32) / jnp.sqrt(fan_in)
    bias = jax.random.normal(kb, (embedding_dim,), dtype=jnp.float32) * 0.01

    # Reference: true strided conv (NCHW), flatten spatial, permute(0, 2, 1).
    ref = jax.lax.conv_general_dilated(
        x, weight, window_strides=(patch_size, patch_size), padding="VALID",
        dimension_numbers=("NCHW", "OIHW", "NCHW")) + bias[None, :, None, None]
    ref = ref.reshape(B, embedding_dim, -1).transpose(0, 2, 1)
    nP = (H // patch_size) * (W // patch_size)

    # Exact-semantics check: f32 MXU inputs.
    out_f32 = jax.block_until_ready(
        patch_embedding(x, weight, bias, patch_size, compute_dtype=jnp.float32))
    assert out_f32.shape == (B, nP, embedding_dim)
    assert jnp.allclose(out_f32, ref, atol=1e-4, rtol=1e-4)

    # Default fast path: bf16 MXU inputs, f32 accumulation (looser tolerance).
    out = jax.block_until_ready(patch_embedding(x, weight, bias, patch_size))
    assert out.shape == (B, nP, embedding_dim)
    assert out.dtype == x.dtype
    assert jnp.allclose(out, ref, atol=3e-2, rtol=3e-2)

    print("KERNEL_OK")
</pallas_src>

<mosaic_0001>
module attributes {stable_mosaic.version = 11 : i64} {
  func.func @_patch_embed_kernel(%arg0: i32, %arg1: memref<16x49xf32, #tpu.memory_space<vmem>>, %arg2: memref<49x128xf32, #tpu.memory_space<vmem>>, %arg3: memref<1x128xf32, #tpu.memory_space<vmem>>, %arg4: memref<16x128xf32, #tpu.memory_space<vmem>>) attributes {dimension_semantics = [#tpu.dimension_semantics<parallel>], iteration_bounds = array<i64: 2>, scalar_prefetch = 0 : i64, scratch_operands = 0 : i64, tpu.core_type = #tpu.core_type<tc>, window_params = [{transform_indices = @transform_0, window_bounds = array<i64: 16, 49>}, {pipeline_mode = #tpu.pipeline_mode<synchronous>, transform_indices = @transform_1, window_bounds = array<i64: 49, 128>}, {pipeline_mode = #tpu.pipeline_mode<synchronous>, transform_indices = @transform_2, window_bounds = array<i64: 1, 128>}, {transform_indices = @transform_3, window_bounds = array<i64: 16, 128>}]} {
    %c0 = arith.constant 0 : index
    %c0_0 = arith.constant 0 : index
    %0 = vector.load %arg1[%c0, %c0_0] : memref<16x49xf32, #tpu.memory_space<vmem>>, vector<16x49xf32>
    %c0_1 = arith.constant 0 : index
    %c0_2 = arith.constant 0 : index
    %1 = vector.load %arg2[%c0_1, %c0_2] : memref<49x128xf32, #tpu.memory_space<vmem>>, vector<49x128xf32>
    %cst = arith.constant dense<0.000000e+00> : vector<16x128xf32>
    %2 = tpu.matmul %0, %1, %cst {dimension_numbers = #tpu.dot_dimension_numbers<[1], [0], [0], [1], [0, 0, 1, 1], [], []>} : vector<16x49xf32>, vector<49x128xf32>, vector<16x128xf32> -> vector<16x128xf32>
    %c0_3 = arith.constant 0 : index
    %c0_4 = arith.constant 0 : index
    %3 = vector.load %arg3[%c0_3, %c0_4] : memref<1x128xf32, #tpu.memory_space<vmem>>, vector<1x128xf32>
    %4 = vector.broadcast %3 : vector<1x128xf32> to vector<16x128xf32>
    %5 = arith.addf %2, %4 : vector<16x128xf32>
    %c0_5 = arith.constant 0 : index
    %c0_6 = arith.constant 0 : index
    %6 = vector.load %arg4[%c0_5, %c0_6] : memref<16x128xf32, #tpu.memory_space<vmem>>, vector<16x128xf32>
    tpu.vector_store %arg4[%c0_5, %c0_6], %5 {strides = array<i32>} : memref<16x128xf32, #tpu.memory_space<vmem>>, vector<16x128xf32>,
    return
  }
  func.func @transform_0(%arg0: i32) -> (i32, i32) {
    %c0_i32 = arith.constant 0 : i32
    %c0_i32_0 = arith.constant 0 : i32
    return %arg0, %c0_i32 : i32, i32
  }
  func.func @transform_1(%arg0: i32) -> (i32, i32) {
    %c0_i32 = arith.constant 0 : i32
    %c0_i32_0 = arith.constant 0 : i32
    %c0_i32_1 = arith.constant 0 : i32
    return %c0_i32, %c0_i32_0 : i32, i32
  }
  func.func @transform_2(%arg0: i32) -> (i32, i32) {
    %c0_i32 = arith.constant 0 : i32
    %c0_i32_0 = arith.constant 0 : i32
    %c0_i32_1 = arith.constant 0 : i32
    return %c0_i32, %c0_i32_0 : i32, i32
  }
  func.func @transform_3(%arg0: i32) -> (i32, i32) {
    %c0_i32 = arith.constant 0 : i32
    %c0_i32_0 = arith.constant 0 : i32
    return %arg0, %c0_i32 : i32, i32
  }
}

</mosaic_0001>

<bundles_post_ra>
// kernel: tpu_custom_call.1
= control target key start
LH: loop header
LB: loop body
LE: loop exit
PB: predicated region body
PF: predicated region fallthrough
CT: control target
= control target key end

     0   :  { %8 = vsyncpa [#allocation3], 0  ;;  %s901_s0 = inlined_call_operand.hbm [shape: f32[32,49], index: 0, kind: input, shape index: {}]   ;;  %s902_s1 = inlined_call_operand.hbm [shape: f32[49,128], index: 1, kind: input, shape index: {}]   ;;  %s903_s2 = inlined_call_operand.vmem [shape: f32[1,128], index: 2, kind: input, shape index: {}]   ;;  %s904_s3 = inlined_call_operand.hbm [shape: f32[32,128], index: 3, kind: output, shape index: {}]  }
   0x1   :  { %10 = vsyncpa [#allocation3 + $0x1], 0 }
   0x2   :  { %11 = vsyncpa [#allocation6], 0 }
   0x3   :  { %12 = vsyncpa [#allocation4], 0 }
   0x4   :  { %14 = vsyncpa [#allocation4 + $0x1], 0  ;;  %s685_s12 = smov 0   ;;  %s687_s13 = smov 0  }
   0x5   :  { %s689_s14 = smov 0   ;;  %s691_s15 = smov 0  }
   0x6 LB: > { %s706_s16 = sadd.s32 4294967295, %s656_s15   ;;  %s407_s17 = sadd.s32 4294967294, %s656_s15   ;;  %s656_s15 = sphi %s691_s15, %s924_s15   ;;  %s652_s14 = sphi %s689_s14, %s923_s14   ;;  %s648_s13 = sphi %s687_s13, %s922_s13   ;;  %s644_s12 = sphi %s685_s12, %s921_s12  }
   0x7   : > { %p40_p0 = scmp.ne.s32.totalorder %s648_s13, %s644_s12  ;;  %p905_p1 = scmp.eq.s32.totalorder %s706_s16, 0 }
   0x8   : > { %p112_p3 = scmp.eq.s32.totalorder %s407_s17, 1  ;;  %p408_p5 = scmp.ge.s32.totalorder %s656_s15, 1 }
   0x9   : > { %p715_p4 = por %p905_p1, %p40_p0  ;;  %p119_p7 = scmp.lt.s32.totalorder %s656_s15, 3 }
   0xa   : > { %p720_p6 = por %p112_p3, %p40_p0  ;;  %s658_s21 = smov [#allocation5]  }
   0xb   : > { %s908_s18 = scalar_select %p715_p4, 1, 0 }
   0xc   : > { %s909_s19 = scalar_select %p720_p6, 1, 0 }
   0xd   : > { %p725_p8 = pnand %p408_p5, %p119_p7  ;;  %s131_s22 = sshll.u32 %s658_s21, 4  ;;  %s729_s22 = int_to_ptr.vmem [resolvable:$true] %s131_s22 }
   0xe   : > { %s741_s24 = sadd.s32 1, %s656_s15   ;;  %s27_s25 = sadd.s32 1, %s652_s14 }
   0xf   : > { %s910_s20 = scalar_select %p725_p8, 1, 0 }
  0x10   : > { %p475_p9 = pneg %p725_p8  ;;  %s24_s26 = ssub.s32 %s656_s15, %s741_s24 }
  0x11   : > { %s528_s29 = scalar_lea.hbm %s902_s1, 896 }
  0x12   : > { %p736_p11 = pnand %p475_p9, %p905_p1  ;;  %p529_p12 = scmp.ne.s32.totalorder %s902_s1, %s528_s29 }
  0x13   : > { %p535_p5 = scmp.lt.u32.totalorder %s528_s29, %s902_s1 }
  0x14   : > { %p530_p13 = pneg %p736_p11 }
  0x16   : > { %p531_p0 = pnand %p530_p13, %p529_p12 }
  0x18   : > { %p532_p3 = pneg %p531_p0 }
  0x1a   : > { %p537_p7 = pnand %p535_p5, %p532_p3 }
  0x1c   : > { %540 = shalt.err (!%p537_p7)
}
  0x1d   : > { %s541_s7 = scalar_lea.vmem %s729_s22, 896  ;;  %p549_p2 = scmp.lt.s32.totalorder %s729_s22, %s729_s22 }
  0x1e   : > { %p542_p9 = scmp.ne.s32.totalorder %s729_s22, %s541_s7  ;;  %p550_p6 = scmp.lt.s32.totalorder %s541_s7, %s541_s7 }
  0x20   : > { %p544_p10 = pnand %p542_p9, %p530_p13  ;;  %p551_p4 = por %p550_p6, %p549_p2 }
  0x22   : > { %p545_p1 = pneg %p544_p10 }
  0x24   : > { %p552_p8 = pnand %p551_p4, %p545_p1 }
  0x26   : > { %555 = shalt.err (!%p552_p8)
}
  0x27   : > { %s659_s8 = smov 128   ;;  %s660_s9 = smov 8  }
  0x28   : > { %478 = dma.hbm_to_vmem [thread:$0]  (!%p736_p11), %s902_s1, 896, %s729_s22, [#allocation6], %s659_s8, %s659_s8, %s660_s9  }
  0x29   : > { %p25_p1 = scmp.eq.s32.totalorder %s24_s26, 0  ;;  %p34_p2 = scmp.ne.s32.totalorder %s652_s14, %s648_s13 }
  0x2a   : > { %p35_p4 = scmp.eq.s32.totalorder %s656_s15, 0  ;;  %p488_p6 = scmp.lt.s32.totalorder %s656_s15, 2 }
  0x2b   : > { %s775_s17 = scalar_select %p25_p1, %s652_s14, %s27_s25  }
  0x2c   : > { %p36_p8 = por %p35_p4, %p34_p2  ;;  %p912_p10 = scmp.eq.s32.totalorder %s706_s16, 1 }
  0x2d   : > { %s148_s23 = sand.u32 1, %s652_s14   ;;  %s427_s27 = sshll.u32 %s656_s15, 8 }
  0x2e   : > { %p779_p12 = por %p912_p10, %p34_p2  ;;  %s411_s28 = sshll.u32 %s148_s23, 4 }
  0x2f   : > { %s788_s4 = scalar_lea.hbm %s901_s0, %s427_s27  ;;  %s152_s22 = scalar_lea.vmem [#allocation2], %s411_s28 }
  0x30   : > { %s159_s25 = sshll.u32 %s152_s22, 4  ;;  %p790_p11 = pnand %p488_p6, %p36_p8  ;;  %s794_s25 = int_to_ptr.vmem [resolvable:$true] %s159_s25 }
  0x31   : > { %s796_s5 = scalar_lea.sflag [#allocation3], %s148_s23  ;;  %s556_s6 = scalar_lea.hbm %s788_s4, 256 }
  0x32   : > { %p557_p13 = scmp.ne.s32.totalorder %s788_s4, %s556_s6  ;;  %p558_p0 = pneg %p790_p11 }
  0x33   : > { %s561_s11 = scalar_lea.hbm %s901_s0, 512  ;;  %p562_p7 = scmp.lt.u32.totalorder %s788_s4, %s901_s0 }
  0x34   : > { %p559_p3 = pnand %p558_p0, %p557_p13  ;;  %p563_p9 = scmp.lt.u32.totalorder %s561_s11, %s556_s6 }
  0x35   : > { %p565_p2 = scmp.lt.u32.totalorder %s556_s6, %s788_s4 }
  0x36   : > { %p560_p5 = pneg %p559_p3  ;;  %p564_p1 = por %p563_p9, %p562_p7 }
  0x38   : > { %p566_p4 = por %p565_p2, %p564_p1 }
  0x3a   : > { %p567_p6 = pnand %p566_p4, %p560_p5 }
  0x3c   : > { %570 = shalt.err (!%p567_p6)
}
  0x3d   : > { %s571_s23 = scalar_lea.vmem %s794_s25, 256  ;;  %s661_s29 = smov [#allocation2]  }
  0x3e   : > { %p572_p8 = scmp.ne.s32.totalorder %s794_s25, %s571_s23  ;;  %s576_s30 = sshll.u32 %s661_s29, 4  ;;  %s577_s30 = int_to_ptr.vmem [resolvable:$false] %s576_s30 }
  0x3f   : > { %s578_s22 = scalar_lea.vmem %s577_s30, 512  ;;  %p579_p3 = scmp.lt.s32.totalorder %s794_s25, %s577_s30 }
  0x40   : > { %p574_p10 = pnand %p572_p8, %p558_p0  ;;  %p580_p7 = scmp.lt.s32.totalorder %s578_s22, %s571_s23 }
  0x42   : > { %p575_p13 = pneg %p574_p10  ;;  %p581_p9 = por %p580_p7, %p579_p3 }
  0x44   : > { %p582_p1 = pnand %p581_p9, %p575_p13 }
  0x46   : > { %585 = shalt.err (!%p582_p1)
}
  0x47   : > { %482 = dma.hbm_to_vmem [thread:$0]  (!%p790_p11), %s788_s4, 256, %s794_s25, %s796_s5, %s659_s8, %s659_s8, %s660_s9  }
  0x48   : > { %p915_p0 = scmp.ne.s32.totalorder %s910_s20, 0 }
  0x49   : > { %s830_s6 = sand.u32 (!%p915_p0), 1, %s648_s13   ;;  %p916_p5 = scmp.ne.s32.totalorder (!%p915_p0), %s908_s18, 0 }
  0x4a   : > { %171 = sbr.rel (%p915_p0) target bundleno = 332 (0x14c), region = 32  ;;  %s415_s7 = sshll.u32 (!%p915_p0), %s830_s6, 4 }
  0x4b   : > { %s174_s10 = scalar_lea.sflag (!%p915_p0), [#allocation3], %s830_s6  ;;  %s177_s26 = scalar_lea.vmem (!%p915_p0), [#allocation2], %s415_s7 }
  0x51   : > { %631 = dma.done.wait (%p916_p5), %s174_s10, 256  }
  0x52   : > { %633 = vsyncadd (%p916_p5), %s174_s10, 4294967040  ;;  %p917_p11 = scmp.eq.s32.totalorder %s706_s16, 0 }
  0x54   : > { %635 = dma.done.wait (%p917_p11), [#allocation6], 896   ;;  %p918_p2 = pmov %p917_p11 }
  0x55   : > { %v208_v0 = vld [vmem:[#allocation5] sm:$0xff]  ;;  %v209_v1 = vld [vmem:[#allocation5 + $0x8] sm:$0xff]  ;;  %v210_v2 = vld [vmem:[#allocation5 + $0x10] sm:$0xff]  ;;  %vm222_vm0 = vcmask 400384   ;;  %vm229_vm1 = vcmask 1040384   ;;  %s203_s18 = scalar_lea.vmem [#allocation7], %s415_s7 }
  0x56   : > { %637 = vsyncadd (%p918_p2), [#allocation6], 4294966400  ;;  %v455_v3 = vpack.c.bf16 %v209_v1, %v208_v0  ;;  %v211_v4 = vld [vmem:[#allocation5 + $0x18] sm:$0xff]  ;;  %v212_v6 = vld [vmem:[#allocation5 + $0x20] sm:$0xff]  ;;  %s324_s20 = sshll.u32 %s203_s18, 4  ;;  %s428_s4 = sshll.u32 %s706_s16, 8  ;;  %s852_s20 = int_to_ptr.vmem [resolvable:$true] %s324_s20 }
  0x57   : > { %v459_v5 = vpack.c.bf16 %v211_v4, %v210_v2  ;;  %v213_v7 = vld [vmem:[#allocation5 + $0x28] sm:$0xff]  ;;  %v206_v8 = vld [vmem:[%s177_s26] sm:$0xff]  ;;  %s857_s11 = scalar_lea.hbm %s904_s3, %s428_s4  ;;  %s311_s27 = scalar_lea.sflag [#allocation4], %s830_s6 }
  0x58   : > { %456 = vmatprep.subr.bf16.mxu0 %v455_v3  ;;  %452 = vmatprep.mubr.msk.f32.mxu0 %vm222_vm0, %v206_v8  ;;  %v463_v9 = vpack.c.bf16 %v213_v7, %v212_v6  ;;  %v214_v10 = vld [vmem:[#allocation5 + $0x30] sm:$0x1]  ;;  %v207_v11 = vld [vmem:[%s177_s26 + $0x8] sm:$0xff]  ;;  %v418_v12 = vld [vmem:[%s903_s2] ss:$0 sm:$0xff]  ;;  %s586_s28 = scalar_lea.vmem %s852_s20, 256 }
  0x59   : > { %458 = vmatpush3.bf16.msra.mxu0 %v455_v3  ;;  %p587_p4 = scmp.ne.s32.totalorder %s852_s20, %s586_s28  ;;  %s662_s16 = smov [#allocation7]  }
  0x5a   : > { %460 = vmatprep.subr.bf16.mxu0 %v459_v5  ;;  %s590_s23 = sshll.u32 %s662_s16, 4  ;;  %s591_s23 = int_to_ptr.vmem [resolvable:$false] %s590_s23 }
  0x5b   : > { %p588_p6 = pnand %p587_p4, %p779_p12  ;;  %s592_s29 = scalar_lea.vmem %s591_s23, 512 }
  0x5c   : > { %p593_p10 = scmp.lt.s32.totalorder %s852_s20, %s591_s23  ;;  %p594_p13 = scmp.lt.s32.totalorder %s592_s29, %s586_s28 }
  0x5d   : > { %462 = vmatpush3.bf16.msra.mxu0 %v459_v5  ;;  %p589_p8 = pneg %p588_p6 }
  0x5e   : > { %464 = vmatprep.subr.bf16.mxu0 %v463_v9  ;;  %p595_p3 = por %p594_p13, %p593_p10 }
  0x60   : > { %p596_p7 = pnand %p595_p3, %p589_p8 }
  0x61   : > { %466 = vmatpush3.bf16.msra.mxu0 %v463_v9 }
  0x62   : > { %450 = vmatprep.subr.msk.mxu0 %vm229_vm1, %v214_v10 }
  0x65   : > { %451 = vmatpush3.msk.msra.mxu0 %vm229_vm1, %v214_v10 }
  0x66   : > { %453 = vmatmul.mubr.msk.f32.vlgmr.msra.gmra.mrb[0].mxu0 %vm222_vm0, %v207_v11 }
 0x139   : > { %v454_v13 = vpop.f32.mrb[0].mxu0 }
 0x13a   : > { %v305_v14 = vadd.f32 %v454_v13, %v418_v12  ;;  %v299_v15 = vpop.f32.mrb[1].mxu0 }
 0x13b   : > { %v300_v16 = vadd.f32 %v418_v12, %v299_v15 }
 0x13c   : > { %309 = vst [vmem:[%s203_s18 + $0x8] sm:$0xff] %v305_v14 }
 0x13d   : > { %308 = vst [vmem:[%s203_s18] sm:$0xff] %v300_v16 }
 0x13e   : > { %599 = shalt.err (!%p596_p7)
}
 0x13f   : > { %s600_s30 = scalar_lea.hbm %s857_s11, 256  ;;  %s604_s10 = scalar_lea.hbm %s904_s3, 512 }
 0x140   : > { %p601_p9 = scmp.ne.s32.totalorder %s857_s11, %s600_s30  ;;  %p605_p5 = scmp.lt.u32.totalorder %s857_s11, %s904_s3 }
 0x141   : > { %p606_p11 = scmp.lt.u32.totalorder %s604_s10, %s600_s30  ;;  %p608_p4 = scmp.lt.u32.totalorder %s600_s30, %s857_s11 }
 0x142   : > { %p602_p1 = pnand %p601_p9, %p779_p12 }
 0x143   : > { %p607_p2 = por %p606_p11, %p605_p5 }
 0x144   : > { %p603_p0 = pneg %p602_p1 }
 0x145   : > { %p609_p6 = por %p608_p4, %p607_p2 }
 0x147   : > { %p610_p8 = pnand %p609_p6, %p603_p0 }
 0x149   : > { %613 = shalt.err (!%p610_p8)
}
 0x14a   : > { %s663_s8 = smov 128   ;;  %s664_s9 = smov 8  }
 0x14b   : > { %473 = dma.vmem_to_hbm [thread:$0]  (%p779_p12), %s852_s20, 256, %s857_s11, %s311_s27, %s663_s8, %s663_s8, %s664_s9  }
 0x14c PF: > { %s339_s4 = sand.u32 1, %s644_s12   ;;  %p919_p10 = scmp.ne.s32.totalorder %s909_s19, 0 }
 0x14d   : > { %p920_p13 = scmp.ge.s32.totalorder %s656_s15, 2  ;;  %s340_s25 = scalar_lea.sflag [#allocation4], %s339_s4 }
 0x14f   : > { %p484_p3 = pnand %p920_p13, %p919_p10 }
 0x151   : > { %639 = dma.done.wait (!%p484_p3), %s340_s25, 256  }
 0x152   : > { %641 = vsyncadd (!%p484_p3), %s340_s25, 4294967040  ;;  %p17_p7 = scmp.ge.s32.totalorder %s741_s24, 4   ;;  %s921_s12 = smov %s648_s13 }
 0x153   : > { %s922_s13 = smov %s652_s14  ;;  %s923_s14 = smov %s775_s17 }
 0x154   : > { %s924_s15 = smov %s741_s24  ;;  %19 = sbr.rel (!%p17_p7) target bundleno = 6 (0x6), region = 81 }
 0x15b   :  { %345 = vsyncpa [#allocation3], 1 }
 0x15c   :  { %347 = vsyncpa [#allocation3 + $0x1], 1 }
 0x15d   :  { %348 = vsyncpa [#allocation6], 1 }
 0x15e   :  { %349 = vsyncpa [#allocation4], 1 }
 0x15f   :  { %351 = vsyncpa [#allocation4 + $0x1], 1 }

</bundles_post_ra>
